<compile_context>
chip_gen: v7x
topology: tpu7x:2x2x1
jax: 0.10.0
libtpu: 0.0.40
codegen_flags: <defaults>
</compile_context>

<pallas_src>
import functools

import jax
import jax.numpy as jnp
from jax.experimental import pallas as pl
from jax.experimental.pallas import tpu as pltpu


# ----------------------------------------------------------------------------
# Tiling helpers
# ----------------------------------------------------------------------------
def _round_up(x, m):
  return (x + m - 1) // m * m


def _choose_tile(dim, cap, align):
  """Return (tile, padded_dim).  Prefers the full dim (<= cap) or an exact
  divisor so activations never need padding; falls back to padding."""
  if dim <= cap:
    return dim, dim
  t = (cap // align) * align
  while t >= align:
    if dim % t == 0:
      return t, dim
    t -= align
  t = (cap // align) * align
  return t, _round_up(dim, t)


def _seq_tile(sp, cap):
  """Tile along a (multiple-of-8) sequence axis: full if small, else divisor."""
  if sp <= cap:
    return sp
  t = (cap // 8) * 8
  while t >= 8:
    if sp % t == 0:
      return t
    t -= 8
  return 8


def _pad2d(x, rows, cols):
  r, c = x.shape
  if r == rows and c == cols:
    return x
  return jnp.pad(x, ((0, rows - r), (0, cols - c)))


# ----------------------------------------------------------------------------
# Tiled matmul with fused epilogue (bias / GELU / LayerScale / residual / LN)
# ----------------------------------------------------------------------------
_TM_CAP, _TN_CAP, _TK_CAP = 512, 1024, 1024


def _make_matmul_kernel(*, has_bias, gelu, has_scale, has_res, ln_mode,
                        use_acc, eps):
  """ln_mode: 0 = none, 1 = LayerNorm applied in place, 2 = extra LN output."""

  def kernel(*refs):
    idx = 0
    a_ref = refs[idx]; idx += 1
    b_ref = refs[idx]; idx += 1
    bias_ref = scale_ref = res_ref = lnw_ref = lnb_ref = None
    if has_bias:
      bias_ref = refs[idx]; idx += 1
    if has_scale:
      scale_ref = refs[idx]; idx += 1
    if has_res:
      res_ref = refs[idx]; idx += 1
    if ln_mode:
      lnw_ref = refs[idx]; idx += 1
      lnb_ref = refs[idx]; idx += 1
    o_ref = refs[idx]; idx += 1
    ln_ref = None
    if ln_mode == 2:
      ln_ref = refs[idx]; idx += 1
    acc_ref = refs[idx] if use_acc else o_ref   # f32 out: accumulate in place

    @pl.when(pl.program_id(2) == 0)
    def _():
      acc_ref[...] = jnp.zeros(acc_ref.shape, acc_ref.dtype)

    acc_ref[...] += jnp.dot(a_ref[...], b_ref[...],
                            preferred_element_type=jnp.float32)

    @pl.when(pl.program_id(2) == pl.num_programs(2) - 1)
    def _():
      y = acc_ref[...].astype(jnp.float32)
      if has_bias:
        y = y + bias_ref[...]
      if gelu:
        # TODO(synk): PyTorch nn.GELU defaults to the exact erf form; the tanh
        # approximation is used here (matched by the reference path).
        y = jax.nn.gelu(y, approximate=True)
      if has_scale:
        y = y * scale_ref[...]
      if has_res:
        y = y + res_ref[...]
      if ln_mode:
        mu = jnp.mean(y, axis=-1, keepdims=True)
        xc = y - mu
        var = jnp.mean(xc * xc, axis=-1, keepdims=True)
        y_ln = xc * jax.lax.rsqrt(var + eps) * lnw_ref[...] + lnb_ref[...]
        if ln_mode == 1:
          y = y_ln
        else:
          ln_ref[...] = y_ln.astype(ln_ref.dtype)
      o_ref[...] = y.astype(o_ref.dtype)

  return kernel


def pallas_matmul(a, b, bias=None, gelu=False, scale=None, residual=None,
                  out_dtype=jnp.float32, ln=None, ln_out=None):
  """out = [residual +] [scale *] [gelu](a @ b [+ bias]), optional fused LN.

  a: (M, K), b: (K, N).  MXU operands are bf16, accumulation is f32.
  ln     = (w, b, eps)        -> LayerNorm applied to the result (one output).
  ln_out = (w, b, eps, dtype) -> returns (out, LayerNorm(result).astype(dtype)).
  """
  M, K = a.shape
  K2, N = b.shape
  assert K == K2, (a.shape, b.shape)
  out_dtype = jnp.dtype(out_dtype)

  tm, Mp = _choose_tile(M, _TM_CAP, 8)
  tn, Np = _choose_tile(N, _TN_CAP, 128)
  tk, Kp = _choose_tile(K, _TK_CAP, 128)

  want_ln = (ln is not None) or (ln_out is not None)
  can_fuse_ln = want_ln and (tn == N) and (Np == N)
  if want_ln and not can_fuse_ln:
    # Rare fallback (only when N needs tiling/padding): unfused LayerNorm.
    raw = pallas_matmul(a, b, bias=bias, gelu=gelu, scale=scale,
                        residual=residual, out_dtype=jnp.float32)
    if ln is not None:
      w_ln, b_ln, eps = ln
      return pallas_layernorm(raw, w_ln, b_ln, eps, out_dtype=out_dtype)
    w_ln, b_ln, eps, ln_dtype = ln_out
    return (raw.astype(out_dtype),
            pallas_layernorm(raw, w_ln, b_ln, eps, out_dtype=ln_dtype))

  use_acc = out_dtype != jnp.dtype(jnp.float32)

  a_p = a.astype(jnp.bfloat16)
  b_p = b.astype(jnp.bfloat16)
  if (Mp, Kp) != (M, K):
    a_p = _pad2d(a_p, Mp, Kp)
  if (Kp, Np) != (K, N):
    b_p = _pad2d(b_p, Kp, Np)

  inputs = [a_p, b_p]
  in_specs = [pl.BlockSpec((tm, tk), lambda i, j, k: (i, k)),
              pl.BlockSpec((tk, tn), lambda i, j, k: (k, j))]

  def add_vec(v):
    v = v.reshape(1, -1).astype(jnp.float32)
    if Np != N:
      v = _pad2d(v, 1, Np)
    inputs.append(v)
    in_specs.append(pl.BlockSpec((1, tn), lambda i, j, k: (0, j)))

  if bias is not None:
    add_vec(bias)
  if scale is not None:
    add_vec(scale)
  if residual is not None:
    r = residual.astype(jnp.float32)
    if (Mp, Np) != (M, N):
      r = _pad2d(r, Mp, Np)
    inputs.append(r)
    in_specs.append(pl.BlockSpec((tm, tn), lambda i, j, k: (i, j)))

  ln_mode, eps, ln_dtype = 0, 1e-6, None
  if can_fuse_ln:
    if ln is not None:
      w_ln, b_ln, eps = ln
      ln_mode = 1
    else:
      w_ln, b_ln, eps, ln_dtype = ln_out
      ln_mode = 2
    add_vec(w_ln)
    add_vec(b_ln)

  out_shapes = [jax.ShapeDtypeStruct((Mp, Np), out_dtype)]
  out_specs = [pl.BlockSpec((tm, tn), lambda i, j, k: (i, j))]
  if ln_mode == 2:
    out_shapes.append(jax.ShapeDtypeStruct((Mp, Np), ln_dtype))
    out_specs.append(pl.BlockSpec((tm, tn), lambda i, j, k: (i, j)))

  scratch = [pltpu.VMEM((tm, tn), jnp.float32)] if use_acc else []
  kernel = _make_matmul_kernel(has_bias=bias is not None, gelu=gelu,
                               has_scale=scale is not None,
                               has_res=residual is not None,
                               ln_mode=ln_mode, use_acc=use_acc, eps=eps)

  results = pl.pallas_call(
      kernel,
      out_shape=tuple(out_shapes) if len(out_shapes) > 1 else out_shapes[0],
      grid_spec=pltpu.PrefetchScalarGridSpec(
          num_scalar_prefetch=0,
          grid=(Mp // tm, Np // tn, Kp // tk),
          in_specs=in_specs,
          out_specs=out_specs if len(out_specs) > 1 else out_specs[0],
          scratch_shapes=scratch,
      ),
      compiler_params=pltpu.CompilerParams(
          dimension_semantics=("parallel", "parallel", "arbitrary"),
          vmem_limit_bytes=32 * 1024 * 1024),
  )(*inputs)

  if ln_mode == 2:
    out, ln_res = results
  else:
    out, ln_res = results, None
  if (Mp, Np) != (M, N):
    out = out[:M, :N]
    if ln_res is not None:
      ln_res = ln_res[:M, :N]
  return (out, ln_res) if ln_mode == 2 else out


# ----------------------------------------------------------------------------
# Row-tiled standalone LayerNorm (only used where it cannot be fused)
# ----------------------------------------------------------------------------
def _ln_kernel(x_ref, w_ref, b_ref, o_ref, *, eps):
  x = x_ref[...].astype(jnp.float32)
  mu = jnp.mean(x, axis=-1, keepdims=True)
  xc = x - mu
  var = jnp.mean(xc * xc, axis=-1, keepdims=True)
  o_ref[...] = (xc * jax.lax.rsqrt(var + eps) * w_ref[...]
                + b_ref[...]).astype(o_ref.dtype)


def pallas_layernorm(x2d, w, b, eps, out_dtype=jnp.float32):
  R, D = x2d.shape
  tr, Rp = _choose_tile(R, 512, 8)
  xp = x2d if Rp == R else jnp.pad(x2d, ((0, Rp - R), (0, 0)))
  out = pl.pallas_call(
      functools.partial(_ln_kernel, eps=eps),
      out_shape=jax.ShapeDtypeStruct((Rp, D), out_dtype),
      grid_spec=pltpu.PrefetchScalarGridSpec(
          num_scalar_prefetch=0,
          grid=(Rp // tr,),
          in_specs=[
              pl.BlockSpec((tr, D), lambda i: (i, 0)),
              pl.BlockSpec((1, D), lambda i: (0, 0)),
              pl.BlockSpec((1, D), lambda i: (0, 0)),
          ],
          out_specs=pl.BlockSpec((tr, D), lambda i: (i, 0)),
      ),
      compiler_params=pltpu.CompilerParams(dimension_semantics=("parallel",)),
  )(xp,
    w.reshape(1, D).astype(jnp.float32),
    b.reshape(1, D).astype(jnp.float32))
  return out[:R] if Rp != R else out


# ----------------------------------------------------------------------------
# Flash-style attention: (B, S, D) in / (B, S, D) out, head split in-kernel
# ----------------------------------------------------------------------------
def _flash_attn_kernel(q_ref, k_ref, v_ref, o_ref, m_sc, l_sc, acc_sc, *,
                       scale, seq_len, kv_tile, heads, dh):
  ki = pl.program_id(2)

  @pl.when(ki == 0)
  def _():
    m_sc[...] = jnp.full(m_sc.shape, -jnp.inf, jnp.float32)
    l_sc[...] = jnp.zeros(l_sc.shape, jnp.float32)
    acc_sc[...] = jnp.zeros(acc_sc.shape, jnp.float32)

  q = q_ref[0]                                    # (tq, D) bf16
  k = k_ref[0]                                    # (tkv, D) bf16
  v = v_ref[0]
  tq, tkv = q.shape[0], k.shape[0]
  kv_ids = ki * kv_tile + jax.lax.broadcasted_iota(jnp.int32, (tq, tkv), 1)
  valid = kv_ids < seq_len                        # mask padded keys

  for h in range(heads):                          # static lane slices per head
    hs = h * dh
    q_h = q[:, hs:hs + dh]
    k_h = k[:, hs:hs + dh]
    v_h = v[:, hs:hs + dh]
    s = jax.lax.dot_general(q_h, k_h, (((1,), (1,)), ((), ())),
                            preferred_element_type=jnp.float32) * scale
    s = jnp.where(valid, s, -1e30)
    m_prev = m_sc[0, :, hs:hs + dh][:, :1]        # state kept in acc layout
    l_prev = l_sc[0, :, hs:hs + dh][:, :1]
    m_new = jnp.maximum(m_prev, jnp.max(s, axis=-1, keepdims=True))
    alpha = jnp.exp(m_prev - m_new)
    p = jnp.exp(s - m_new)
    l_new = alpha * l_prev + jnp.sum(p, axis=-1, keepdims=True)
    acc_sc[0, :, hs:hs + dh] = (
        alpha * acc_sc[0, :, hs:hs + dh]
        + jnp.dot(p.astype(v_h.dtype), v_h, preferred_element_type=jnp.float32))
    m_sc[0, :, hs:hs + dh] = jnp.broadcast_to(m_new, (tq, dh))
    l_sc[0, :, hs:hs + dh] = jnp.broadcast_to(l_new, (tq, dh))

  @pl.when(ki == pl.num_programs(2) - 1)
  def _():
    # l is broadcast over each head's lane group -> single lane-dense store.
    o_ref[...] = (acc_sc[...] *
                  pl.reciprocal(l_sc[...], approx=True)).astype(o_ref.dtype)


def pallas_attention(q, k, v, scale, seq_len, heads, out_dtype=jnp.bfloat16):
  """q, k, v: (B, Sp, D) with Sp % 8 == 0; returns (B, Sp, D)."""
  B, Sp, D = q.shape
  assert Sp % 8 == 0 and D % heads == 0
  dh = D // heads
  tq = _seq_tile(Sp, 128)
  tkv = _seq_tile(Sp, 512)
  kernel = functools.partial(_flash_attn_kernel, scale=scale, seq_len=seq_len,
                             kv_tile=tkv, heads=heads, dh=dh)
  return pl.pallas_call(
      kernel,
      out_shape=jax.ShapeDtypeStruct((B, Sp, D), out_dtype),
      grid_spec=pltpu.PrefetchScalarGridSpec(
          num_scalar_prefetch=0,
          grid=(B, Sp // tq, Sp // tkv),
          in_specs=[
              pl.BlockSpec((1, tq, D), lambda b, qi, ki: (b, qi, 0)),
              pl.BlockSpec((1, tkv, D), lambda b, qi, ki: (b, ki, 0)),
              pl.BlockSpec((1, tkv, D), lambda b, qi, ki: (b, ki, 0)),
          ],
          out_specs=pl.BlockSpec((1, tq, D), lambda b, qi, ki: (b, qi, 0)),
          scratch_shapes=[pltpu.VMEM((1, tq, D), jnp.float32)] * 3,
      ),
      compiler_params=pltpu.CompilerParams(
          dimension_semantics=("parallel", "parallel", "arbitrary")),
  )(q.astype(jnp.bfloat16), k.astype(jnp.bfloat16), v.astype(jnp.bfloat16))


# ----------------------------------------------------------------------------
# Pure-JAX reference ops (identical mixed-precision policy)
# ----------------------------------------------------------------------------
def _ref_ln_math(y, w, b, eps):
  mu = y.mean(-1, keepdims=True)
  xc = y - mu
  var = (xc * xc).mean(-1, keepdims=True)
  return xc * jax.lax.rsqrt(var + eps) * w.reshape(1, -1) + b.reshape(1, -1)


def _ref_mm(a, b, bias=None, gelu=False, scale=None, residual=None,
            out_dtype=jnp.float32, ln=None, ln_out=None):
  y = jnp.dot(a.astype(jnp.bfloat16), b.astype(jnp.bfloat16),
              preferred_element_type=jnp.float32)
  if bias is not None:
    y = y + bias.reshape(1, -1).astype(jnp.float32)
  if gelu:
    y = jax.nn.gelu(y, approximate=True)
  if scale is not None:
    y = y * scale.reshape(1, -1).astype(jnp.float32)
  if residual is not None:
    y = y + residual.astype(jnp.float32)
  if ln is not None:
    w, bb, eps = ln
    return _ref_ln_math(y, w, bb, eps).astype(out_dtype)
  if ln_out is not None:
    w, bb, eps, ln_dtype = ln_out
    return y.astype(out_dtype), _ref_ln_math(y, w, bb, eps).astype(ln_dtype)
  return y.astype(out_dtype)


def _ref_layernorm(x2d, w, b, eps, out_dtype=jnp.float32):
  return _ref_ln_math(x2d.astype(jnp.float32), w, b, eps).astype(out_dtype)


def _ref_attention(q, k, v, scale, seq_len, heads, out_dtype=jnp.bfloat16):
  B, Sp, D = q.shape
  dh = D // heads

  def split(x):
    return jnp.transpose(x.reshape(B, Sp, heads, dh),
                         (0, 2, 1, 3)).astype(jnp.bfloat16)

  qh, kh, vh = split(q), split(k), split(v)
  s = jnp.einsum("bhqd,bhkd->bhqk", qh, kh,
                 preferred_element_type=jnp.float32) * scale
  mask = (jnp.arange(Sp) < seq_len)[None, None, None, :]
  s = jnp.where(mask, s, -1e30)
  p = jax.nn.softmax(s, axis=-1)
  o = jnp.einsum("bhqk,bhkd->bhqd", p.astype(jnp.bfloat16), vh,
                 preferred_element_type=jnp.float32)
  return jnp.transpose(o, (0, 2, 1, 3)).reshape(B, Sp, D).astype(out_dtype)


def make_ops(use_pallas):
  if use_pallas:
    return pallas_matmul, pallas_layernorm, pallas_attention
  return _ref_mm, _ref_layernorm, _ref_attention


# ----------------------------------------------------------------------------
# Parameters (deterministic synthetic init; shapes follow the module __init__)
# ----------------------------------------------------------------------------
def init_params(key, *, in_ch, patch, embed_dim, depth, heads, mlp_ratio,
                num_patches, out_chans):
  del heads
  keys = iter(jax.random.split(key, 8 + 16 * depth))

  def nrm(shape, std=0.02):
    return (std * jax.random.normal(next(keys), shape)).astype(jnp.float32)

  p = {
      "patch_w": nrm((embed_dim, in_ch, patch, patch)),   # Conv2d(k=p, s=p)
      "patch_b": nrm((embed_dim,)),
      "cls": nrm((1, 1, embed_dim)),
      "pos": nrm((1, 1 + num_patches, embed_dim)),
      "blocks": [],
      "neck_conv1_w": nrm((out_chans, embed_dim, 1, 1)),
      "neck_ln1_w": jnp.ones((out_chans,), jnp.float32),
      "neck_ln1_b": jnp.zeros((out_chans,), jnp.float32),
      "neck_conv2_w": nrm((out_chans, out_chans, 3, 3)),
      "neck_ln2_w": jnp.ones((out_chans,), jnp.float32),
      "neck_ln2_b": jnp.zeros((out_chans,), jnp.float32),
  }
  hid = mlp_ratio * embed_dim
  for _ in range(depth):
    p["blocks"].append({
        "ln1_w": jnp.ones((embed_dim,), jnp.float32),
        "ln1_b": jnp.zeros((embed_dim,), jnp.float32),
        # q/k/v projections stored separately so each lands in (B*S, D) layout
        # without any head-split transpose.
        "q_w": nrm((embed_dim, embed_dim)), "q_b": nrm((embed_dim,)),
        "k_w": nrm((embed_dim, embed_dim)), "k_b": nrm((embed_dim,)),
        "v_w": nrm((embed_dim, embed_dim)), "v_b": nrm((embed_dim,)),
        "proj_w": nrm((embed_dim, embed_dim)), "proj_b": nrm((embed_dim,)),
        "ls1": jnp.full((embed_dim,), 0.1, jnp.float32),
        "ln2_w": jnp.ones((embed_dim,), jnp.float32),
        "ln2_b": jnp.zeros((embed_dim,), jnp.float32),
        "fc1_w": nrm((embed_dim, hid)), "fc1_b": nrm((hid,)),
        "fc2_w": nrm((hid, embed_dim)), "fc2_b": nrm((embed_dim,)),
        "ls2": jnp.full((embed_dim,), 0.1, jnp.float32),
    })
  return p


# ----------------------------------------------------------------------------
# Forward pass (mirrors DINOv2EncoderViT.forward)
# ----------------------------------------------------------------------------
def encoder_forward_features(params, x_nchw, ops, *, patch, embed_dim, heads):
  """Compact DINOv2-style ViT; returns padded x_prenorm (B, Sp, D) and S."""
  mm, ln, attn = ops
  B, C, H, W = x_nchw.shape
  hp, wp = H // patch, W // patch
  n_tok = hp * wp

  # Patch embedding: Conv2d(k=p, s=p) == per-patch flatten (glue) + matmul.
  xp = x_nchw.reshape(B, C, hp, patch, wp, patch)
  xp = jnp.transpose(xp, (0, 2, 4, 1, 3, 5)).reshape(
      B * n_tok, C * patch * patch)
  w_pe = params["patch_w"].reshape(embed_dim, C * patch * patch).T
  tok = mm(xp, w_pe, bias=params["patch_b"]).reshape(B, n_tok, embed_dim)

  cls = jnp.broadcast_to(params["cls"], (B, 1, embed_dim))
  x = jnp.concatenate([cls, tok], axis=1) + params["pos"]           # (B, S, D)
  S = x.shape[1]
  # Pad the token axis ONCE; everything stays padded through the block loop.
  Sp = _round_up(S, 8)
  if Sp != S:
    x = jnp.pad(x, ((0, 0), (0, Sp - S), (0, 0)))
  x2d = x.reshape(B * Sp, embed_dim)                  # f32 residual carry
  dh = embed_dim // heads
  scale = dh ** -0.5

  blocks = params["blocks"]
  hln = ln(x2d, blocks[0]["ln1_w"], blocks[0]["ln1_b"], 1e-6,
           out_dtype=jnp.bfloat16)                    # norm1 of block 0
  for i, blk in enumerate(blocks):
    # --- attention branch (hln == norm1(x), bf16) ---
    q = mm(hln, blk["q_w"], bias=blk["q_b"], out_dtype=jnp.bfloat16)
    k = mm(hln, blk["k_w"], bias=blk["k_b"], out_dtype=jnp.bfloat16)
    v = mm(hln, blk["v_w"], bias=blk["v_b"], out_dtype=jnp.bfloat16)
    o = attn(q.reshape(B, Sp, embed_dim), k.reshape(B, Sp, embed_dim),
             v.reshape(B, Sp, embed_dim), scale, S, heads,
             out_dtype=jnp.bfloat16)
    # proj matmul: LayerScale + residual + norm2 fused into the epilogue
    x2d, hln = mm(o.reshape(B * Sp, embed_dim), blk["proj_w"],
                  bias=blk["proj_b"], scale=blk["ls1"], residual=x2d,
                  out_dtype=jnp.float32,
                  ln_out=(blk["ln2_w"], blk["ln2_b"], 1e-6, jnp.bfloat16))
    # --- mlp branch (hln == norm2(x)) ---
    hmid = mm(hln, blk["fc1_w"], bias=blk["fc1_b"], gelu=True,
              out_dtype=jnp.bfloat16)
    if i + 1 < len(blocks):
      nxt = blocks[i + 1]
      x2d, hln = mm(hmid, blk["fc2_w"], bias=blk["fc2_b"], scale=blk["ls2"],
                    residual=x2d, out_dtype=jnp.float32,
                    ln_out=(nxt["ln1_w"], nxt["ln1_b"], 1e-6, jnp.bfloat16))
    else:
      x2d = mm(hmid, blk["fc2_w"], bias=blk["fc2_b"], scale=blk["ls2"],
               residual=x2d, out_dtype=jnp.float32)   # x_prenorm (no norm)

  return x2d.reshape(B, Sp, embed_dim), S


def neck_forward(params, emb_nhwc, ops, *, out_chans):
  """Conv1x1 -> LayerNorm2d -> Conv3x3(pad=1) -> LayerNorm2d (bias-free convs,
  LayerNorm2d fused into each conv's matmul epilogue)."""
  mm, _, _ = ops
  B, h, w, D = emb_nhwc.shape

  # 1x1 conv == per-pixel matmul over channels, with fused channel LayerNorm.
  w1 = params["neck_conv1_w"].reshape(out_chans, D).T               # (D, out)
  y = mm(emb_nhwc.reshape(B * h * w, D), w1,
         ln=(params["neck_ln1_w"], params["neck_ln1_b"], 1e-6),
         out_dtype=jnp.bfloat16)
  y = y.reshape(B, h, w, out_chans)

  # 3x3 conv, padding=1: im2col (XLA glue) + tiled Pallas matmul + fused LN.
  # TODO(synk): replace im2col with shifted-tap accumulating matmuls to avoid
  # materializing the 9x activation tensor in HBM (neck is small vs. trunk).
  yp = jnp.pad(y, ((0, 0), (1, 1), (1, 1), (0, 0)))
  cols = jnp.concatenate(
      [yp[:, dy:dy + h, dx:dx + w, :] for dy in range(3) for dx in range(3)],
      axis=-1).reshape(B * h * w, 9 * out_chans)
  w2 = jnp.transpose(params["neck_conv2_w"], (2, 3, 1, 0)).reshape(
      9 * out_chans, out_chans)                                     # (kh,kw,cin,cout)
  z = mm(cols, w2, ln=(params["neck_ln2_w"], params["neck_ln2_b"], 1e-6),
         out_dtype=jnp.float32)
  return jnp.transpose(z.reshape(B, h, w, out_chans), (0, 3, 1, 2))  # NCHW


def dinov2_encoder_vit_forward(params, x_nchw, *, patch, embed_dim, heads,
                               out_chans, use_pallas=True):
  ops = make_ops(use_pallas)
  B, _, H, W = x_nchw.shape
  h, w = H // patch, W // patch
  feats_padded, _ = encoder_forward_features(
      params, x_nchw, ops, patch=patch, embed_dim=embed_dim, heads=heads)
  # Drop cls token and padded rows; (B, hw, D) row-major (h, w) == NHWC view
  # of the PyTorch permute(0,2,1).reshape(B, D, h, w) tensor.
  emb_nhwc = feats_padded[:, 1:1 + h * w].reshape(B, h, w, embed_dim)
  return neck_forward(params, emb_nhwc, ops, out_chans=out_chans)


# ----------------------------------------------------------------------------
if __name__ == "__main__":
  B, C, H, W = 2, 3, 16, 16
  patch, embed_dim, depth, heads, mlp_ratio, out_chans = 4, 32, 2, 2, 4, 64

  key = jax.random.PRNGKey(0)
  pkey, xkey = jax.random.split(key)
  params = init_params(
      pkey, in_ch=C, patch=patch, embed_dim=embed_dim, depth=depth,
      heads=heads, mlp_ratio=mlp_ratio,
      num_patches=(H // patch) * (W // patch), out_chans=out_chans)
  x = jax.random.normal(xkey, (B, C, H, W), jnp.float32)

  fwd = functools.partial(dinov2_encoder_vit_forward, patch=patch,
                          embed_dim=embed_dim, heads=heads,
                          out_chans=out_chans)
  out = jax.block_until_ready(fwd(params, x, use_pallas=True))
  ref = jax.block_until_ready(fwd(params, x, use_pallas=False))

  assert out.shape == (B, out_chans, H // patch, W // patch), out.shape
  assert bool(jnp.all(jnp.isfinite(out)))
  max_err = float(jnp.max(jnp.abs(out - ref)))
  assert max_err < 2e-2, f"mismatch vs pure-JAX reference: {max_err}"
  print("KERNEL_OK")
</pallas_src>

<mosaic_0001>
module attributes {stable_mosaic.version = 11 : i64} {
  func.func @kernel(%arg0: i32, %arg1: i32, %arg2: i32, %arg3: memref<32x48xbf16, #tpu.memory_space<vmem>>, %arg4: memref<48x32xbf16, #tpu.memory_space<vmem>>, %arg5: memref<1x32xf32, #tpu.memory_space<vmem>>, %arg6: memref<32x32xf32, #tpu.memory_space<vmem>>) attributes {dimension_semantics = [#tpu.dimension_semantics<parallel>, #tpu.dimension_semantics<parallel>, #tpu.dimension_semantics<arbitrary>], iteration_bounds = array<i64: 1, 1, 1>, scalar_prefetch = 0 : i64, scratch_operands = 0 : i64, tpu.core_type = #tpu.core_type<tc>, window_params = [{transform_indices = @transform_0, window_bounds = array<i64: 32, 48>}, {transform_indices = @transform_1, window_bounds = array<i64: 48, 32>}, {transform_indices = @transform_2, window_bounds = array<i64: 1, 32>}, {transform_indices = @transform_3, window_bounds = array<i64: 32, 32>}]} {
    %c0_i32 = arith.constant 0 : i32
    %0 = arith.cmpi eq, %arg2, %c0_i32 : i32
    %1 = arith.extui %0 : i1 to i32
    %c0_i32_0 = arith.constant 0 : i32
    %2 = arith.cmpi ne, %1, %c0_i32_0 : i32
    scf.if %2 {
      %cst_10 = arith.constant 0.000000e+00 : f32
      %12 = vector.broadcast %cst_10 : f32 to vector<32x32xf32>
      %c0_11 = arith.constant 0 : index
      %c0_12 = arith.constant 0 : index
      %13 = vector.load %arg6[%c0_11, %c0_12] : memref<32x32xf32, #tpu.memory_space<vmem>>, vector<32x32xf32>
      tpu.vector_store %arg6[%c0_11, %c0_12], %12 {strides = array<i32>} : memref<32x32xf32, #tpu.memory_space<vmem>>, vector<32x32xf32>,
    } else {
    }
    %c0 = arith.constant 0 : index
    %c0_1 = arith.constant 0 : index
    %3 = vector.load %arg6[%c0, %c0_1] : memref<32x32xf32, #tpu.memory_space<vmem>>, vector<32x32xf32>
    %c0_2 = arith.constant 0 : index
    %c0_3 = arith.constant 0 : index
    %4 = vector.load %arg3[%c0_2, %c0_3] : memref<32x48xbf16, #tpu.memory_space<vmem>>, vector<32x48xbf16>
    %c0_4 = arith.constant 0 : index
    %c0_5 = arith.constant 0 : index
    %5 = vector.load %arg4[%c0_4, %c0_5] : memref<48x32xbf16, #tpu.memory_space<vmem>>, vector<48x32xbf16>
    %cst = arith.constant dense<0.000000e+00> : vector<32x32xf32>
    %6 = tpu.matmul %4, %5, %cst {dimension_numbers = #tpu.dot_dimension_numbers<[1], [0], [0], [1], [0, 0, 1, 1], [], []>} : vector<32x48xbf16>, vector<48x32xbf16>, vector<32x32xf32> -> vector<32x32xf32>
    %7 = arith.addf %3, %6 : vector<32x32xf32>
    %c0_6 = arith.constant 0 : index
    %c0_7 = arith.constant 0 : index
    %8 = vector.load %arg6[%c0_6, %c0_7] : memref<32x32xf32, #tpu.memory_space<vmem>>, vector<32x32xf32>
    tpu.vector_store %arg6[%c0_6, %c0_7], %7 {strides = array<i32>} : memref<32x32xf32, #tpu.memory_space<vmem>>, vector<32x32xf32>,
    %c0_i32_8 = arith.constant 0 : i32
    %9 = arith.cmpi eq, %arg2, %c0_i32_8 : i32
    %10 = arith.extui %9 : i1 to i32
    %c0_i32_9 = arith.constant 0 : i32
    %11 = arith.cmpi ne, %10, %c0_i32_9 : i32
    scf.if %11 {
      %c0_10 = arith.constant 0 : index
      %c0_11 = arith.constant 0 : index
      %12 = vector.load %arg6[%c0_10, %c0_11] : memref<32x32xf32, #tpu.memory_space<vmem>>, vector<32x32xf32>
      %c0_12 = arith.constant 0 : index
      %c0_13 = arith.constant 0 : index
      %13 = vector.load %arg5[%c0_12, %c0_13] : memref<1x32xf32, #tpu.memory_space<vmem>>, vector<1x32xf32>
      %14 = vector.broadcast %13 : vector<1x32xf32> to vector<32x32xf32>
      %15 = arith.addf %12, %14 : vector<32x32xf32>
      %c0_14 = arith.constant 0 : index
      %c0_15 = arith.constant 0 : index
      %16 = vector.load %arg6[%c0_14, %c0_15] : memref<32x32xf32, #tpu.memory_space<vmem>>, vector<32x32xf32>
      tpu.vector_store %arg6[%c0_14, %c0_15], %15 {strides = array<i32>} : memref<32x32xf32, #tpu.memory_space<vmem>>, vector<32x32xf32>,
    } else {
    }
    return
  }
  func.func @transform_0(%arg0: i32, %arg1: i32, %arg2: i32) -> (i32, i32) {
    %c0_i32 = arith.constant 0 : i32
    return %arg0, %arg2 : i32, i32
  }
  func.func @transform_1(%arg0: i32, %arg1: i32, %arg2: i32) -> (i32, i32) {
    %c0_i32 = arith.constant 0 : i32
    return %arg2, %arg1 : i32, i32
  }
  func.func @transform_2(%arg0: i32, %arg1: i32, %arg2: i32) -> (i32, i32) {
    %c0_i32 = arith.constant 0 : i32
    %c0_i32_0 = arith.constant 0 : i32
    return %c0_i32, %arg1 : i32, i32
  }
  func.func @transform_3(%arg0: i32, %arg1: i32, %arg2: i32) -> (i32, i32) {
    %c0_i32 = arith.constant 0 : i32
    return %arg0, %arg1 : i32, i32
  }
}

</mosaic_0001>

<bundles_post_ra>
// kernel: tpu_custom_call.1
= control target key start
LH: loop header
LB: loop body
LE: loop exit
PB: predicated region body
PF: predicated region fallthrough
CT: control target
= control target key end

     0   :  { %vm20_vm0 = vcmask 261120   ;;  %vm67_vm1 = vcmask 392192   ;;  %v226_v3 = vmov 0.0   ;;  %s294_s0 = inlined_call_operand.vmem [shape: bf16[32,48], index: 0, kind: input, shape index: {}]   ;;  %s295_s1 = inlined_call_operand.vmem [shape: bf16[48,32], index: 1, kind: input, shape index: {}]   ;;  %s296_s2 = inlined_call_operand.vmem [shape: f32[1,32], index: 2, kind: input, shape index: {}]   ;;  %s297_s3 = inlined_call_operand.hbm [shape: f32[32,32], index: 3, kind: output, shape index: {}]  }
   0x1   :  { %v197_v0 = vld [vmem:[%s295_s1] sm:$0xff]   ;;  %v198_v1 = vld [vmem:[%s295_s1 + $0x8] sm:$0xff]   ;;  %23 = vst.msk [vmem:[#allocation2 + $0x10] sm:$0xff] %vm20_vm0, %v226_v3  ;;  %21 = vst.msk [vmem:[#allocation2] sm:$0xff] %vm20_vm0, %v226_v3 }
   0x2   :  { %183 = vmatprep.subr.bf16.mxu0 %v197_v0  ;;  %v200_v2 = vld [vmem:[%s294_s0] sm:$0xff]   ;;  %22 = vst.msk [vmem:[#allocation2 + $0x8] sm:$0xff] %vm20_vm0, %v226_v3  ;;  %24 = vst.msk [vmem:[#allocation2 + $0x18] sm:$0xff] %vm20_vm0, %v226_v3  ;;  %v199_v4 = vld [vmem:[%s295_s1 + $0x10] sm:$0xff]  }
   0x3   :  { %184 = vmatpush3.bf16.msra.mxu0 %v197_v0  ;;  %189 = vmatprep.mubr.msk.bf16.mxu0 %vm67_vm1, %v200_v2 }
   0x4   :  { %185 = vmatprep.subr.bf16.mxu0 %v198_v1 }
   0x5   :  { %8 = vsyncpa [#allocation3], 0  ;;  %v201_v5 = vld [vmem:[%s294_s0 + $0x8] sm:$0xff]   ;;  %v177_v18 = vld [vmem:[%s296_s2] ss:$0 sm:$0xff]  ;;  %s227_s22 = smov [#allocation2]  }
   0x6   :  { %s159_s23 = sshll.u32 %s227_s22, 4  ;;  %s160_s23 = int_to_ptr.vmem [resolvable:$true] %s159_s23 }
   0x7   :  { %186 = vmatpush3.bf16.msra.mxu0 %v198_v1  ;;  %s202_s2 = scalar_lea.vmem %s160_s23, 512  ;;  %p207_p1 = scmp.lt.s32.totalorder %s160_s23, %s160_s23 }
   0x8   :  { %187 = vmatprep.subr.bf16.mxu0 %v199_v4  ;;  %v27_v6 = vld [vmem:[#allocation2 + $0x10] sm:$0xff]  ;;  %v25_v7 = vld [vmem:[#allocation2] sm:$0xff]  ;;  %p203_p0 = scmp.ne.s32.totalorder %s160_s23, %s202_s2  ;;  %p208_p2 = scmp.lt.s32.totalorder %s202_s2, %s202_s2 }
   0x9   :  { %v28_v9 = vld [vmem:[#allocation2 + $0x18] sm:$0xff]  ;;  %v26_v12 = vld [vmem:[#allocation2 + $0x8] sm:$0xff] }
   0xa   :  { %p209_p3 = por %p208_p2, %p207_p1 }
   0xb   :  { %188 = vmatpush3.bf16.msra.mxu0 %v199_v4 }
   0xc   :  { %p210_p4 = pnand %p209_p3, %p203_p0 }
   0xe   :  { %190 = vmatmul.mubr.msk.bf16.vlgmr.msra.gmra.mrb[0].mxu0 %vm67_vm1, %v201_v5 }
  0xe1   :  { %v191_v8 = vpop.f32.mrb[0].mxu0 }
  0xe2   :  { %v125_v10 = vadd.f32 %v191_v8, %v27_v6  ;;  %v108_v11 = vpop.f32.mrb[1].mxu0 }
  0xe3   :  { %v123_v13 = vadd.f32 %v108_v11, %v25_v7  ;;  %v192_v14 = vpop.f32.mrb[2].mxu0 }
  0xe4   :  { %130 = vst.msk [vmem:[#allocation2 + $0x10] sm:$0xff] %vm20_vm0, %v125_v10  ;;  %v126_v15 = vadd.f32 %v192_v14, %v28_v9  ;;  %v111_v16 = vpop.f32.mrb[3].mxu0 }
  0xe5   :  { %128 = vst.msk [vmem:[#allocation2] sm:$0xff] %vm20_vm0, %v123_v13  ;;  %v124_v17 = vadd.f32 %v111_v16, %v26_v12 }
  0xe6   :  { %131 = vst.msk [vmem:[#allocation2 + $0x18] sm:$0xff] %vm20_vm0, %v126_v15 }
  0xe7   :  { %129 = vst.msk [vmem:[#allocation2 + $0x8] sm:$0xff] %vm20_vm0, %v124_v17 }
  0xeb   :  { %v137_v19 = vld [vmem:[#allocation2 + $0x10] sm:$0xff] }
  0xec   :  { %v148_v20 = vadd.f32 %v177_v18, %v137_v19  ;;  %v135_v21 = vld [vmem:[#allocation2] sm:$0xff] }
  0xed   :  { %v146_v22 = vadd.f32 %v177_v18, %v135_v21  ;;  %v138_v23 = vld [vmem:[#allocation2 + $0x18] sm:$0xff] }
  0xee   :  { %152 = vst.msk [vmem:[#allocation2 + $0x10] sm:$0xff] %vm20_vm0, %v148_v20  ;;  %v149_v24 = vadd.f32 %v177_v18, %v138_v23  ;;  %v136_v25 = vld [vmem:[#allocation2 + $0x8] sm:$0xff] }
  0xef   :  { %150 = vst.msk [vmem:[#allocation2] sm:$0xff] %vm20_vm0, %v146_v22  ;;  %v147_v26 = vadd.f32 %v177_v18, %v136_v25 }
  0xf0   :  { %153 = vst.msk [vmem:[#allocation2 + $0x18] sm:$0xff] %vm20_vm0, %v149_v24 }
  0xf1   :  { %151 = vst.msk [vmem:[#allocation2 + $0x8] sm:$0xff] %vm20_vm0, %v147_v26 }
  0xf2   :  { %213 = shalt.err (!%p210_p4)
}
  0xf3   :  { %s214_s26 = scalar_lea.hbm %s297_s3, 512 }
  0xf4   :  { %p215_p5 = scmp.ne.s32.totalorder %s297_s3, %s214_s26  ;;  %p218_p6 = scmp.lt.u32.totalorder %s214_s26, %s297_s3 }
  0xf6   :  { %p220_p7 = pnand %p218_p6, %p215_p5 }
  0xf8   :  { %223 = shalt.err (!%p220_p7)
}
  0xf9   :  { %s228_s4 = smov 128   ;;  %s229_s5 = smov 8  }
  0xfa   :  { %165 = dma.vmem_to_hbm [thread:$0]  %s160_s23, 512, %s297_s3, [#allocation3], %s228_s4, %s228_s4, %s229_s5  }
  0xfb   :  { %224 = dma.done.wait [#allocation3], 512  }
  0xfc   :  { %225 = vsyncadd [#allocation3], 4294966784 }
  0xfd   :  { %169 = vsyncpa [#allocation3], 1 }

</bundles_post_ra>
